<compile_context>
chip_gen: v7x
topology: tpu7x:2x2x1
jax: 0.10.0
libtpu: 0.0.40
codegen_flags: <defaults>
</compile_context>

<pallas_src>
import jax
import jax.numpy as jnp
from jax.experimental import pallas as pl
from jax.experimental.pallas import tpu as pltpu

# --- problem sizes (CartPole-style Categorical DQN) ---
ob_size = 4
ac_size = 2
n_atoms = 51
batch_size = 8
HIDDEN = 256
OUT = ac_size * n_atoms        # 102 (ragged)
OUT_PAD = 128                  # lane-dense padded output width
ACT_PAD = 16                   # fixed act-path batch pad (full (16,128) bf16 tile)
LEARN_BLK = 256                # rows per grid step on the learn path (v7x-friendly)


def _net_kernel(x_ref, w1_ref, b1_ref, w2_ref, b2_ref, o_ref):
    x = x_ref[...]                                    # (rows, ob_size) f32
    rows = x.shape[0]
    # fc1 on the VPU, in f32 (v5e has no native bf16 VALU path). Bias broadcast
    # is hoisted out of the unrolled K=4 loop.
    h = jnp.broadcast_to(b1_ref[...], (rows, HIDDEN))
    for k in range(ob_size):                          # static unroll, K = 4
        h = h + x[:, k:k + 1] * w1_ref[k:k + 1, :]
    h = jnp.maximum(h, 0.0)                           # ReLU
    # fc2 on the MXU: bf16 operands (half the weight DMA / MXU passes), f32
    # accumulation, lane-dense (rows, 128) unmasked store.
    y = jnp.dot(h.astype(jnp.bfloat16), w2_ref[...],
                preferred_element_type=jnp.float32)
    o_ref[...] = (y + b2_ref[...]).astype(o_ref.dtype)


def _call_small(x_pad, w1, b1, w2p, b2p):
    """Act path: single no-grid invocation, all operands resident in VMEM."""
    bp = x_pad.shape[0]
    vmem = pl.BlockSpec(memory_space=pltpu.MemorySpace.VMEM)
    return pl.pallas_call(
        _net_kernel,
        out_shape=jax.ShapeDtypeStruct((bp, OUT_PAD), jnp.float32),
        in_specs=[vmem, vmem, vmem, vmem, vmem],
        out_specs=vmem,
    )(x_pad, w1, b1, w2p, b2p)


def _call_grid(x_pad, w1, b1, w2p, b2p):
    """Learn path: parallel grid over LEARN_BLK-row batch blocks.

    Weight BlockSpecs return a constant block index, so the weights are DMA'd
    once and stay VMEM-resident across grid steps; the parallel batch axis lets
    v7x shard row blocks across its two TensorCores.
    """
    bp = x_pad.shape[0]
    grid = (bp // LEARN_BLK,)
    return pl.pallas_call(
        _net_kernel,
        out_shape=jax.ShapeDtypeStruct((bp, OUT_PAD), jnp.float32),
        grid=grid,
        in_specs=[
            pl.BlockSpec((LEARN_BLK, ob_size), lambda i: (i, 0)),   # x
            pl.BlockSpec((ob_size, HIDDEN),    lambda i: (0, 0)),   # w1 (resident)
            pl.BlockSpec((1, HIDDEN),          lambda i: (0, 0)),   # b1 (resident)
            pl.BlockSpec((HIDDEN, OUT_PAD),    lambda i: (0, 0)),   # w2 (resident)
            pl.BlockSpec((1, OUT_PAD),         lambda i: (0, 0)),   # b2 (resident)
        ],
        out_specs=pl.BlockSpec((LEARN_BLK, OUT_PAD), lambda i: (i, 0)),
        compiler_params=pltpu.CompilerParams(
            dimension_semantics=("parallel",)),
    )(x_pad, w1, b1, w2p, b2p)


@jax.jit
def _forward_padded(x_pad, w1, b1, w2p, b2p):
    # Shape is static at trace time: small fixed bucket -> no-grid path,
    # large (multiple of LEARN_BLK) bucket -> gridded path.
    if x_pad.shape[0] <= ACT_PAD:
        return _call_small(x_pad, w1, b1, w2p, b2p)
    return _call_grid(x_pad, w1, b1, w2p, b2p)


def net_forward(x, w1, b1, w2p, b2p):
    """Forward pass matching PyTorch Net.forward.

    x: (ob_size,)      single observation -> (1, ac_size, n_atoms)
       (B,  ob_size)   batch              -> (B, ac_size, n_atoms)

    Padding/bucketing happens here (outside the jit), so the pallas_call only
    compiles for a fixed act-path shape and LEARN_BLK-multiple learn shapes.
    """
    if x.ndim == 1:
        # PyTorch: x.size()[0] == 4 -> single (unbatched) observation
        x2d = x.reshape(1, ob_size)
    else:
        x2d = x
    b = x2d.shape[0]

    if b <= ACT_PAD:
        b_pad = ACT_PAD                                           # fixed act bucket
    else:
        b_pad = ((b + LEARN_BLK - 1) // LEARN_BLK) * LEARN_BLK    # learn bucket
    if b_pad != b:
        x2d = jnp.pad(x2d, ((0, b_pad - b), (0, 0)))

    out = _forward_padded(x2d, w1, b1, w2p, b2p)
    # slice padded rows / padded lanes off BEFORE the reshape so atom ordering
    # is preserved
    return out[:b, :OUT].reshape(b, ac_size, n_atoms)


def init_params(key):
    """Deterministic PyTorch-style Linear init: U(-1/sqrt(fan_in), 1/sqrt(fan_in)).

    Weights are stored as (in, out) == W.T relative to PyTorch's (out, in).
    """
    k1, k2, k3, k4 = jax.random.split(key, 4)
    bound1 = 1.0 / jnp.sqrt(jnp.float32(ob_size))
    bound2 = 1.0 / jnp.sqrt(jnp.float32(HIDDEN))
    w1 = jax.random.uniform(k1, (ob_size, HIDDEN), jnp.float32, -bound1, bound1)
    b1 = jax.random.uniform(k2, (1, HIDDEN), jnp.float32, -bound1, bound1)
    w2 = jax.random.uniform(k3, (HIDDEN, OUT), jnp.float32, -bound2, bound2)
    b2 = jax.random.uniform(k4, (1, OUT), jnp.float32, -bound2, bound2)
    return w1, b1, w2, b2


def pad_fc2(w2, b2):
    """Zero-pad fc2 params from 102 to 128 output columns (once); w2 -> bf16."""
    w2p = jnp.pad(w2, ((0, 0), (0, OUT_PAD - OUT))).astype(jnp.bfloat16)
    b2p = jnp.pad(b2, ((0, 0), (0, OUT_PAD - OUT)))   # bias stays f32
    return w2p, b2p


if __name__ == "__main__":
    key = jax.random.PRNGKey(0)
    pkey, xkey = jax.random.split(key)
    w1, b1, w2, b2 = init_params(pkey)
    w2p, b2p = pad_fc2(w2, b2)

    def ref_forward(x2d):
        return (jnp.maximum(x2d @ w1 + b1, 0.0) @ w2 + b2)

    # --- batched act-path input (batch_size, ob_size) ---
    x = jax.random.normal(xkey, (batch_size, ob_size), jnp.float32)
    out = jax.block_until_ready(net_forward(x, w1, b1, w2p, b2p))
    assert out.shape == (batch_size, ac_size, n_atoms)
    ref = ref_forward(x).reshape(batch_size, ac_size, n_atoms)
    assert jnp.allclose(out, ref, atol=2e-2, rtol=2e-2), \
        "mismatch vs reference (batched)"

    # --- unbatched: single observation of length 4 -> miniBatch = 1 ---
    x1 = jax.random.normal(jax.random.PRNGKey(1), (ob_size,), jnp.float32)
    out1 = jax.block_until_ready(net_forward(x1, w1, b1, w2p, b2p))
    assert out1.shape == (1, ac_size, n_atoms)
    ref1 = ref_forward(x1.reshape(1, ob_size)).reshape(1, ac_size, n_atoms)
    assert jnp.allclose(out1, ref1, atol=2e-2, rtol=2e-2), \
        "mismatch vs reference (unbatched)"

    # --- large learn-path batch: exercises the parallel grid / resident weights ---
    xl = jax.random.normal(jax.random.PRNGKey(2), (512, ob_size), jnp.float32)
    outl = jax.block_until_ready(net_forward(xl, w1, b1, w2p, b2p))
    assert outl.shape == (512, ac_size, n_atoms)
    refl = ref_forward(xl).reshape(512, ac_size, n_atoms)
    assert jnp.allclose(outl, refl, atol=2e-2, rtol=2e-2), \
        "mismatch vs reference (learn batch)"

    print("KERNEL_OK")
</pallas_src>

<mosaic_0001>
module attributes {stable_mosaic.version = 11 : i64} {
  func.func @_net_kernel(%arg0: memref<16x4xf32, #tpu.memory_space<vmem>>, %arg1: memref<4x256xf32, #tpu.memory_space<vmem>>, %arg2: memref<1x256xf32, #tpu.memory_space<vmem>>, %arg3: memref<256x128xbf16, #tpu.memory_space<vmem>>, %arg4: memref<1x128xf32, #tpu.memory_space<vmem>>, %arg5: memref<16x128xf32, #tpu.memory_space<vmem>>) attributes {dimension_semantics = [], scalar_prefetch = 0 : i64, scratch_operands = 0 : i64, tpu.core_type = #tpu.core_type<tc>} {
    %c0 = arith.constant 0 : index
    %c0_0 = arith.constant 0 : index
    %0 = vector.load %arg0[%c0, %c0_0] : memref<16x4xf32, #tpu.memory_space<vmem>>, vector<16x4xf32>
    %c0_1 = arith.constant 0 : index
    %c0_2 = arith.constant 0 : index
    %1 = vector.load %arg2[%c0_1, %c0_2] : memref<1x256xf32, #tpu.memory_space<vmem>>, vector<1x256xf32>
    %2 = vector.shape_cast %1 : vector<1x256xf32> to vector<1x256xf32>
    %3 = vector.broadcast %2 : vector<1x256xf32> to vector<16x256xf32>
    %4 = vector.extract_strided_slice %0 {offsets = [0, 0], sizes = [16, 1], strides = [1, 1]} : vector<16x4xf32> to vector<16x1xf32>
    %c0_3 = arith.constant 0 : index
    %c0_4 = arith.constant 0 : index
    %5 = vector.load %arg1[%c0_3, %c0_4] : memref<4x256xf32, #tpu.memory_space<vmem>>, vector<1x256xf32>
    %6 = vector.broadcast %4 : vector<16x1xf32> to vector<16x256xf32>
    %7 = vector.broadcast %5 : vector<1x256xf32> to vector<16x256xf32>
    %8 = arith.mulf %6, %7 : vector<16x256xf32>
    %9 = arith.addf %3, %8 : vector<16x256xf32>
    %10 = vector.extract_strided_slice %0 {offsets = [0, 1], sizes = [16, 1], strides = [1, 1]} : vector<16x4xf32> to vector<16x1xf32>
    %c1 = arith.constant 1 : index
    %c0_5 = arith.constant 0 : index
    %11 = vector.load %arg1[%c1, %c0_5] : memref<4x256xf32, #tpu.memory_space<vmem>>, vector<1x256xf32>
    %12 = vector.broadcast %10 : vector<16x1xf32> to vector<16x256xf32>
    %13 = vector.broadcast %11 : vector<1x256xf32> to vector<16x256xf32>
    %14 = arith.mulf %12, %13 : vector<16x256xf32>
    %15 = arith.addf %9, %14 : vector<16x256xf32>
    %16 = vector.extract_strided_slice %0 {offsets = [0, 2], sizes = [16, 1], strides = [1, 1]} : vector<16x4xf32> to vector<16x1xf32>
    %c2 = arith.constant 2 : index
    %c0_6 = arith.constant 0 : index
    %17 = vector.load %arg1[%c2, %c0_6] : memref<4x256xf32, #tpu.memory_space<vmem>>, vector<1x256xf32>
    %18 = vector.broadcast %16 : vector<16x1xf32> to vector<16x256xf32>
    %19 = vector.broadcast %17 : vector<1x256xf32> to vector<16x256xf32>
    %20 = arith.mulf %18, %19 : vector<16x256xf32>
    %21 = arith.addf %15, %20 : vector<16x256xf32>
    %22 = vector.extract_strided_slice %0 {offsets = [0, 3], sizes = [16, 1], strides = [1, 1]} : vector<16x4xf32> to vector<16x1xf32>
    %c3 = arith.constant 3 : index
    %c0_7 = arith.constant 0 : index
    %23 = vector.load %arg1[%c3, %c0_7] : memref<4x256xf32, #tpu.memory_space<vmem>>, vector<1x256xf32>
    %24 = vector.broadcast %22 : vector<16x1xf32> to vector<16x256xf32>
    %25 = vector.broadcast %23 : vector<1x256xf32> to vector<16x256xf32>
    %26 = arith.mulf %24, %25 : vector<16x256xf32>
    %27 = arith.addf %21, %26 : vector<16x256xf32>
    %cst = arith.constant 0.000000e+00 : f32
    %28 = vector.broadcast %cst : f32 to vector<16x256xf32>
    %29 = arith.maximumf %27, %28 : vector<16x256xf32>
    %30 = arith.truncf %29 : vector<16x256xf32> to vector<16x256xbf16>
    %c0_8 = arith.constant 0 : index
    %c0_9 = arith.constant 0 : index
    %31 = vector.load %arg3[%c0_8, %c0_9] : memref<256x128xbf16, #tpu.memory_space<vmem>>, vector<256x128xbf16>
    %cst_10 = arith.constant dense<0.000000e+00> : vector<16x128xf32>
    %32 = tpu.matmul %30, %31, %cst_10 {dimension_numbers = #tpu.dot_dimension_numbers<[1], [0], [0], [1], [0, 0, 1, 1], [], []>} : vector<16x256xbf16>, vector<256x128xbf16>, vector<16x128xf32> -> vector<16x128xf32>
    %c0_11 = arith.constant 0 : index
    %c0_12 = arith.constant 0 : index
    %33 = vector.load %arg4[%c0_11, %c0_12] : memref<1x128xf32, #tpu.memory_space<vmem>>, vector<1x128xf32>
    %34 = vector.broadcast %33 : vector<1x128xf32> to vector<16x128xf32>
    %35 = arith.addf %32, %34 : vector<16x128xf32>
    %c0_13 = arith.constant 0 : index
    %c0_14 = arith.constant 0 : index
    %36 = vector.load %arg5[%c0_13, %c0_14] : memref<16x128xf32, #tpu.memory_space<vmem>>, vector<16x128xf32>
    tpu.vector_store %arg5[%c0_13, %c0_14], %35 {strides = array<i32>} : memref<16x128xf32, #tpu.memory_space<vmem>>, vector<16x128xf32>,
    return
  }
}

</mosaic_0001>

<bundles_post_ra>
// kernel: _forward_padded.1
= control target key start
LH: loop header
LB: loop body
LE: loop exit
PB: predicated region body
PF: predicated region fallthrough
CT: control target
= control target key end

     0   :  { %10 = vsyncpa [#allocation3], 0  ;;  %s578_s0 = inlined_call_operand.vmem [shape: f32[16,4], index: 0, kind: input, shape index: {}]   ;;  %s579_s1 = inlined_call_operand.vmem [shape: f32[4,256], index: 1, kind: input, shape index: {}]   ;;  %s580_s2 = inlined_call_operand.vmem [shape: f32[1,256], index: 2, kind: input, shape index: {}]   ;;  %s581_s3 = inlined_call_operand.hbm [shape: bf16[256,128], index: 3, kind: input, shape index: {}]   ;;  %s582_s4 = inlined_call_operand.vmem [shape: f32[1,128], index: 4, kind: input, shape index: {}]   ;;  %s583_s5 = inlined_call_operand.hbm [shape: f32[16,128], index: 5, kind: output, shape index: {}]  }
   0x1   :  { %11 = vsyncpa [#allocation4], 0  ;;  %s490_s18 = smov [#allocation2]   ;;  %s442_s22 = scalar_lea.hbm %s581_s3, 2048 }
   0x2   :  { %s23_s19 = sshll.u32 %s490_s18, 4  ;;  %p443_p0 = scmp.ne.s32.totalorder %s581_s3, %s442_s22  ;;  %s24_s19 = int_to_ptr.vmem [resolvable:$true] %s23_s19 }
   0x3   :  { %p446_p1 = scmp.lt.u32.totalorder %s442_s22, %s581_s3 }
   0x5   :  { %p448_p2 = pnand %p446_p1, %p443_p0 }
   0x7   :  { %451 = shalt.err (!%p448_p2)
}
   0x8   :  { %s452_s27 = scalar_lea.vmem %s24_s19, 2048  ;;  %p457_p4 = scmp.lt.s32.totalorder %s24_s19, %s24_s19 }
   0x9   :  { %p453_p3 = scmp.ne.s32.totalorder %s24_s19, %s452_s27  ;;  %p458_p5 = scmp.lt.s32.totalorder %s452_s27, %s452_s27 }
   0xb   :  { %p459_p6 = por %p458_p5, %p457_p4 }
   0xd   :  { %p460_p7 = pnand %p459_p6, %p453_p3 }
   0xf   :  { %463 = shalt.err (!%p460_p7)
}
  0x10   :  { %s491_s28 = smov 64   ;;  %s492_s29 = smov 4  }
  0x11   :  { %29 = dma.hbm_to_vmem [thread:$0]  %s581_s3, 2048, %s24_s19, [#allocation3], %s491_s28, %s491_s28, %s492_s29  }
  0x12   :  { %486 = dma.done.wait [#allocation3], 2048  }
  0x13   :  { %487 = vsyncadd [#allocation3], 4294965248  ;;  %v493_v0 = vmov 1   ;;  %v494_v1 = vmov 0   ;;  %v36_v2 = vld [vmem:[%s578_s0] sm:$0xff]  ;;  %v37_v3 = vld [vmem:[%s578_s0 + $0x8] sm:$0xff]  ;;  %v40_v22 = vlaneseq }
  0x14   :  { %421 = vset.pattern.permute.xlu1 %v493_v0  ;;  %420 = vset.pattern.permute.xlu0 %v494_v1  ;;  %v426_v4 = vld [vmem:[#allocation2 + $0x40] sm:$0xff]   ;;  %v428_v6 = vld [vmem:[#allocation2 + $0x48] sm:$0xff]   ;;  %v430_v8 = vld [vmem:[#allocation2 + $0x50] sm:$0xff]   ;;  %v495_v10 = vmov 2   ;;  %v496_v14 = vmov 3   ;;  %s497_s19 = smov [#allocation5]  }
  0x15   :  { %83 = vperm.xlu1 %421, %v36_v2   ;;  %53 = vperm.xlu0 %420, %v36_v2   ;;  %v427_v5 = vld [vmem:[#allocation2] sm:$0xff]   ;;  %v429_v7 = vld [vmem:[#allocation2 + $0x8] sm:$0xff]   ;;  %v431_v9 = vld [vmem:[#allocation2 + $0x10] sm:$0xff]   ;;  %v41_v23 = vshrl.u32 %v40_v22, 7  ;;  %s356_s20 = sshll.u32 %s497_s19, 4  ;;  %s357_s20 = int_to_ptr.vmem [resolvable:$true] %s356_s20 }
  0x16   :  { %388 = vmatprep.subr.bf16.mxu0 %v426_v4  ;;  %v432_v11 = vld [vmem:[#allocation2 + $0x58] sm:$0xff]   ;;  %v434_v13 = vld [vmem:[#allocation2 + $0x60] sm:$0xff]   ;;  %v436_v16 = vld [vmem:[#allocation2 + $0x68] sm:$0xff]   ;;  %s464_s21 = scalar_lea.vmem %s357_s20, 256  ;;  %p469_p9 = scmp.lt.s32.totalorder %s357_s20, %s357_s20 }
  0x17   :  { %389 = vmatpush3.bf16.msra.mxu0 %v427_v5  ;;  %v433_v12 = vld [vmem:[#allocation2 + $0x18] sm:$0xff]   ;;  %v435_v15 = vld [vmem:[#allocation2 + $0x20] sm:$0xff]   ;;  %v437_v17 = vld [vmem:[#allocation2 + $0x28] sm:$0xff]   ;;  %v42_v24 = vsub.s32 0, %v41_v23  ;;  %v46_v25 = vsub.s32 1, %v41_v23  ;;  %p465_p8 = scmp.ne.s32.totalorder %s357_s20, %s464_s21  ;;  %p470_p10 = scmp.lt.s32.totalorder %s464_s21, %s464_s21 }
  0x18   :  { %390 = vmatprep.subr.bf16.mxu0 %v428_v6  ;;  %v438_v18 = vld [vmem:[#allocation2 + $0x70] sm:$0xff]   ;;  %v440_v20 = vld [vmem:[#allocation2 + $0x78] sm:$0xff]   ;;  %v50_v26 = vld [vmem:[%s579_s1] ss:$4 sm:$0x3] }
  0x19   :  { %87 = vperm.xlu1 %421, %v37_v3   ;;  %58 = vperm.xlu0 %420, %v37_v3   ;;  %v439_v19 = vld [vmem:[#allocation2 + $0x30] sm:$0xff]   ;;  %v441_v21 = vld [vmem:[#allocation2 + $0x38] sm:$0xff]   ;;  %v65_v28 = vrot.slane %v50_v26, %v42_v24  ;;  %v69_v29 = vrot.slane %v50_v26, %v46_v25  ;;  %v38_v31 = vld [vmem:[%s580_s2] sm:$0x3]  ;;  %p471_p11 = por %p470_p10, %p469_p9 }
  0x1a   :  { %v368_v32 = vld [vmem:[%s579_s1 + $0x1] ss:$4 sm:$0x3]  ;;  %v369_v33 = vld [vmem:[%s579_s1 + $0x2] ss:$4 sm:$0x3]  ;;  %v43_v34 = vrot.slane %v38_v31, %v42_v24  ;;  %v47_v35 = vrot.slane %v38_v31, %v46_v25 }
  0x1b   :  { %391 = vmatpush3.bf16.msra.mxu0 %v429_v7  ;;  %v94_v40 = vrot.slane %v368_v32, %v42_v24  ;;  %v98_v41 = vrot.slane %v368_v32, %v46_v25  ;;  %v123_v44 = vrot.slane %v369_v33, %v42_v24  ;;  %v127_v45 = vrot.slane %v369_v33, %v46_v25  ;;  %v370_v52 = vld [vmem:[%s579_s1 + $0x3] ss:$4 sm:$0x3]  ;;  %p472_p12 = pnand %p471_p11, %p465_p8 }
  0x1c   :  { %392 = vmatprep.subr.bf16.mxu0 %v430_v8  ;;  %v152_v63 = vrot.slane %v370_v52, %v42_v24  ;;  %v156_v0 = vrot.slane %v370_v52, %v46_v25  ;;  %v371_v24 = vld [vmem:[%s582_s4] ss:$0 sm:$0xff] }
  0x1d   :  { %423 = vset.pattern.permute.xlu1 %v495_v10  ;;  %422 = vset.pattern.permute.xlu0 %v495_v10 }
  0x1e   :  { %116 = vperm.xlu1 %423, %v37_v3   ;;  %112 = vperm.xlu0 %422, %v36_v2  }
  0x1f   :  { %393 = vmatpush3.bf16.msra.mxu0 %v431_v9 }
  0x20   :  { %394 = vmatprep.subr.bf16.mxu0 %v432_v11 }
  0x22   :  { %424 = vset.pattern.permute.xlu1 %v496_v14  ;;  %425 = vset.pattern.permute.xlu0 %v496_v14 }
  0x23   :  { %141 = vperm.xlu1 %424, %v36_v2   ;;  %145 = vperm.xlu0 %425, %v37_v3  }
  0x24   :  { %395 = vmatpush3.bf16.msra.mxu0 %v433_v12 }
  0x25   :  { %396 = vmatprep.subr.bf16.mxu0 %v434_v13 }
  0x28   :  { %397 = vmatpush3.bf16.msra.mxu0 %v435_v15 }
  0x29   :  { %398 = vmatprep.subr.bf16.mxu0 %v436_v16 }
  0x2c   :  { %399 = vmatpush3.bf16.msra.mxu0 %v437_v17 }
  0x2d   :  { %400 = vmatprep.subr.bf16.mxu0 %v438_v18 }
  0x30   :  { %401 = vmatpush3.bf16.msra.mxu0 %v439_v19 }
  0x31   :  { %402 = vmatprep.subr.bf16.mxu0 %v440_v20 }
  0x34   :  { %403 = vmatpush3.bf16.msra.mxu0 %v441_v21 }
  0x94   :  { %v84_v27 = vpop.permute.xlu1 %83  ;;  %v54_v30 = vpop.permute.xlu0 %53 }
  0x95   :  { %v72_v36 = vmul.f32 %v65_v28, %v54_v30  ;;  %v73_v37 = vmul.f32 %v69_v29, %v54_v30  ;;  %v101_v53 = vmul.f32 %v94_v40, %v84_v27  ;;  %v102_v54 = vmul.f32 %v98_v41, %v84_v27 }
  0x97   :  { %v76_v50 = vadd.f32 %v72_v36, %v43_v34  ;;  %v77_v51 = vadd.f32 %v73_v37, %v47_v35 }
  0x98   :  { %v88_v38 = vpop.permute.xlu1 %87  ;;  %v59_v39 = vpop.permute.xlu0 %58 }
  0x99   :  { %v74_v42 = vmul.f32 %v65_v28, %v59_v39  ;;  %v75_v43 = vmul.f32 %v69_v29, %v59_v39  ;;  %v103_v46 = vmul.f32 %v94_v40, %v88_v38  ;;  %v104_v47 = vmul.f32 %v98_v41, %v88_v38 }
  0x9a   :  { %v105_v1 = vadd.f32 %v101_v53, %v76_v50  ;;  %v106_v2 = vadd.f32 %v102_v54, %v77_v51 }
  0x9b   :  { %v78_v48 = vadd.f32 %v74_v42, %v43_v34  ;;  %v79_v49 = vadd.f32 %v75_v43, %v47_v35 }
  0x9d   :  { %v117_v55 = vpop.permute.xlu1 %116  ;;  %v107_v56 = vadd.f32 %v103_v46, %v78_v48  ;;  %v108_v57 = vadd.f32 %v104_v47, %v79_v49  ;;  %v113_v58 = vpop.permute.xlu0 %112 }
  0x9e   :  { %v132_v59 = vmul.f32 %v123_v44, %v117_v55  ;;  %v133_v60 = vmul.f32 %v127_v45, %v117_v55  ;;  %v130_v61 = vmul.f32 %v123_v44, %v113_v58  ;;  %v131_v62 = vmul.f32 %v127_v45, %v113_v58 }
  0xa0   :  { %v136_v3 = vadd.f32 %v132_v59, %v107_v56  ;;  %v137_v4 = vadd.f32 %v133_v60, %v108_v57  ;;  %v134_v5 = vadd.f32 %v130_v61, %v105_v1  ;;  %v135_v6 = vadd.f32 %v131_v62, %v106_v2 }
  0xa2   :  { %v142_v7 = vpop.permute.xlu1 %141  ;;  %v146_v8 = vpop.permute.xlu0 %145 }
  0xa3   :  { %v159_v9 = vmul.f32 %v152_v63, %v142_v7  ;;  %v160_v10 = vmul.f32 %v156_v0, %v142_v7  ;;  %v161_v11 = vmul.f32 %v152_v63, %v146_v8  ;;  %v162_v12 = vmul.f32 %v156_v0, %v146_v8 }
  0xa5   :  { %v163_v13 = vadd.f32 %v159_v9, %v134_v5  ;;  %v165_v14 = vadd.f32 %v161_v11, %v136_v3  ;;  %v164_v15 = vadd.f32 %v160_v10, %v135_v6  ;;  %v166_v16 = vadd.f32 %v162_v12, %v137_v4 }
  0xa7   :  { %v167_v17 = vmax.f32 %v163_v13, 0.0  ;;  %v169_v18 = vmax.f32 %v165_v14, 0.0  ;;  %v168_v19 = vmax.f32 %v164_v15, 0.0  ;;  %v170_v20 = vmax.f32 %v166_v16, 0.0 }
  0xa9   :  { %v172_v21 = vpack.c.bf16 %v170_v20, %v168_v19  ;;  %v171_v22 = vpack.c.bf16 %v169_v18, %v167_v17 }
  0xab   :  { %340 = vmatprep.mubr.bf16.mxu0 %v172_v21 }
  0xac   :  { %341 = vmatmul.mubr.bf16.vlgmr.msra.gmra.mrb[0].mxu0 %v171_v22 }
 0x17f   :  { %v404_v23 = vpop.f32.mrb[0].mxu0 }
 0x180   :  { %v405_v25 = vpop.f32.mrb[1].mxu0 }
 0x181   :  { %v406_v26 = vadd.f32 %v405_v25, %v404_v23  ;;  %v407_v27 = vpop.f32.mrb[2].mxu0 }
 0x182   :  { %v408_v28 = vpop.f32.mrb[3].mxu0 }
 0x183   :  { %v343_v29 = vadd.f32 %v406_v26, %v371_v24  ;;  %v409_v30 = vadd.f32 %v408_v28, %v407_v27 }
 0x185   :  { %349 = vst [vmem:[#allocation5] sm:$0xff] %v343_v29  ;;  %v346_v31 = vadd.f32 %v409_v30, %v371_v24 }
 0x187   :  { %350 = vst [vmem:[#allocation5 + $0x8] sm:$0xff] %v346_v31 }
 0x188   :  { %475 = shalt.err (!%p472_p12)
}
 0x189   :  { %s476_s23 = scalar_lea.hbm %s583_s5, 256 }
 0x18a   :  { %p477_p13 = scmp.ne.s32.totalorder %s583_s5, %s476_s23  ;;  %p480_p0 = scmp.lt.u32.totalorder %s476_s23, %s583_s5 }
 0x18c   :  { %p482_p1 = pnand %p480_p0, %p477_p13 }
 0x18e   :  { %485 = shalt.err (!%p482_p1)
}
 0x18f   :  { %s498_s28 = smov 128   ;;  %s499_s29 = smov 8  }
 0x190   :  { %362 = dma.vmem_to_hbm [thread:$0]  %s357_s20, 256, %s583_s5, [#allocation4], %s498_s28, %s498_s28, %s499_s29  }
 0x191   :  { %488 = dma.done.wait [#allocation4], 256  }
 0x192   :  { %489 = vsyncadd [#allocation4], 4294967040 }
 0x193   :  { %366 = vsyncpa [#allocation3], 1 }
 0x194   :  { %367 = vsyncpa [#allocation4], 1 }

</bundles_post_ra>
